<compile_context>
chip_gen: v7x
topology: tpu7x:2x2x1
jax: 0.10.0
libtpu: 0.0.40
codegen_flags: <defaults>
</compile_context>

<pallas_src>
import jax
import jax.numpy as jnp
from jax.experimental import pallas as pl
from jax.experimental.pallas import tpu as pltpu


def _round_up(v, m):
    return ((v + m - 1) // m) * m


def _make_fused_mlp_kernel(num_hidden):
    """Fused y = relu(...relu(relu(x@W0+b0)@W1+b1)...) on one row tile."""
    if num_hidden > 0:

        def kernel(x_ref, w0_ref, b0_ref, wh_ref, bh_ref, o_ref):
            h = jnp.dot(x_ref[...], w0_ref[...],
                        preferred_element_type=jnp.float32)
            h = jnp.maximum(h + b0_ref[...], 0.0)
            # Static (unrolled) loop over hidden layers; weights are VMEM-resident.
            for l in range(num_hidden):
                h = jnp.dot(h, wh_ref[l], preferred_element_type=jnp.float32)
                h = jnp.maximum(h + bh_ref[l], 0.0)
            o_ref[...] = h.astype(o_ref.dtype)

    else:

        def kernel(x_ref, w0_ref, b0_ref, o_ref):
            h = jnp.dot(x_ref[...], w0_ref[...],
                        preferred_element_type=jnp.float32)
            o_ref[...] = jnp.maximum(h + b0_ref[...], 0.0).astype(o_ref.dtype)

    return kernel


def fused_mlp(x2d, params, *, tm_max=512):
    """x2d: (M, C) f32; params: [(W_in, b_in), (W_h, b_h), ...] with W:(in,out).

    Returns (M, E) f32 = relu(...relu(x @ W0 + b0)... @ W_{L-1} + b_{L-1}),
    computed in a single pallas_call (one HBM read of x, one HBM write of y).
    """
    M, C = x2d.shape
    E = params[0][0].shape[1]
    num_hidden = len(params) - 1
    dt = x2d.dtype

    # Lane-dense padded feature dims (multiples of 128).
    C_pad = _round_up(max(C, 1), 128)
    E_pad = _round_up(max(E, 1), 128)

    # Row tile: as large as practical (mem-bound), sublane aligned. Pad M once.
    tm = min(tm_max, _round_up(M, 8))
    M_pad = pl.cdiv(M, tm) * tm

    # Zero-pad everything once.
    x_p = jnp.zeros((M_pad, C_pad), dt).at[:M, :C].set(x2d)
    w0, b0 = params[0]
    w0_p = jnp.zeros((C_pad, E_pad), dt).at[:C, :E].set(w0)
    b0_p = jnp.zeros((1, E_pad), dt).at[0, :E].set(b0)

    operands = [x_p, w0_p, b0_p]
    in_specs = [
        pl.BlockSpec((tm, C_pad), lambda i: (i, 0)),        # row tile of x
        pl.BlockSpec((C_pad, E_pad), lambda i: (0, 0)),     # input weight, resident
        pl.BlockSpec((1, E_pad), lambda i: (0, 0)),         # input bias, resident
    ]

    if num_hidden > 0:
        wh = jnp.stack([w for w, _ in params[1:]])            # (L-1, E, E)
        bh = jnp.stack([b for _, b in params[1:]])[:, None]   # (L-1, 1, E)
        wh_p = jnp.zeros((num_hidden, E_pad, E_pad), dt).at[:, :E, :E].set(wh)
        bh_p = jnp.zeros((num_hidden, 1, E_pad), dt).at[:, :, :E].set(bh)
        operands += [wh_p, bh_p]
        in_specs += [
            pl.BlockSpec((num_hidden, E_pad, E_pad), lambda i: (0, 0, 0)),
            pl.BlockSpec((num_hidden, 1, E_pad), lambda i: (0, 0, 0)),
        ]

    # VMEM budget: double-buffered x/out tiles + resident padded weights/biases
    # + headroom for in-flight f32 activations. The cap is a limit (not a
    # reservation) and stays below the 64 MiB/TC of v7x when possible.
    itemsize = jnp.dtype(dt).itemsize
    resident = (C_pad * E_pad + E_pad
                + num_hidden * (E_pad * E_pad + E_pad)) * itemsize
    tiles = (2 * tm * C_pad + 2 * tm * E_pad) * itemsize
    acts = 4 * tm * E_pad * 4
    vmem_limit = int(min(100 * 1024 * 1024,
                         max(32 * 1024 * 1024, 2 * (resident + tiles + acts))))

    out = pl.pallas_call(
        _make_fused_mlp_kernel(num_hidden),
        out_shape=jax.ShapeDtypeStruct((M_pad, E_pad), dt),
        grid_spec=pltpu.PrefetchScalarGridSpec(
            num_scalar_prefetch=0,
            grid=(M_pad // tm,),
            in_specs=in_specs,
            out_specs=pl.BlockSpec((tm, E_pad), lambda i: (i, 0)),
        ),
        compiler_params=pltpu.CompilerParams(
            dimension_semantics=("parallel",),   # v7x: 2 TCs split the row tiles
            vmem_limit_bytes=vmem_limit,
        ),
    )(*operands)

    # Single slice at the end strips row + lane padding.
    return out[:M, :E]


def init_mlp_params(key, sensor_channels, num_layers, embedding_size):
    """Deterministic init matching torch.nn.Linear default (U[-1/sqrt(fan_in), +])."""
    params = []
    dims_in = [sensor_channels] + [embedding_size] * (num_layers - 1)
    for d_in in dims_in:
        kw, kb, key = jax.random.split(key, 3)
        bound = 1.0 / jnp.sqrt(d_in)
        w = jax.random.uniform(kw, (d_in, embedding_size), jnp.float32,
                               minval=-bound, maxval=bound)
        b = jax.random.uniform(kb, (embedding_size,), jnp.float32,
                               minval=-bound, maxval=bound)
        params.append((w, b))
    return params


@jax.jit
def mlp_forward(x, params):
    """Mirrors MLP.forward: returns (embedding, pred, reconst) with pred=reconst=0."""
    B, T, C = x.shape
    h = fused_mlp(x.reshape(B * T, C), params)
    embedding = h.reshape(B, T, -1)
    pred = 0
    reconst = 0
    return embedding, pred, reconst


if __name__ == "__main__":
    # Small shapes consistent with the module's forward:
    # sensor_channels=4, window_length=8, num_layers=3, embedding_size=32
    sensor_channels = 4
    window_length = 8
    num_layers = 3
    embedding_size = 32
    batch = 2

    key = jax.random.PRNGKey(0)
    kx, kp = jax.random.split(key)
    x = jax.random.normal(kx, (batch, window_length, sensor_channels), jnp.float32)
    params = init_mlp_params(kp, sensor_channels, num_layers, embedding_size)

    embedding, pred, reconst = mlp_forward(x, params)
    jax.block_until_ready(embedding)

    # Sanity check against plain-JAX reference.
    h = x.reshape(-1, sensor_channels)
    for w, b in params:
        h = jnp.maximum(h @ w + b, 0.0)
    ref = h.reshape(batch, window_length, embedding_size)
    assert embedding.shape == (batch, window_length, embedding_size)
    assert jnp.allclose(embedding, ref, atol=1e-5, rtol=1e-5)
    assert pred == 0 and reconst == 0

    print("KERNEL_OK")
</pallas_src>

<mosaic_0001>
module attributes {stable_mosaic.version = 11 : i64} {
  func.func @kernel(%arg0: i32, %arg1: memref<16x128xf32, #tpu.memory_space<vmem>>, %arg2: memref<128x128xf32, #tpu.memory_space<vmem>>, %arg3: memref<1x128xf32, #tpu.memory_space<vmem>>, %arg4: memref<2x128x128xf32, #tpu.memory_space<vmem>>, %arg5: memref<2x1x128xf32, #tpu.memory_space<vmem>>, %arg6: memref<16x128xf32, #tpu.memory_space<vmem>>) attributes {dimension_semantics = [#tpu.dimension_semantics<parallel>], iteration_bounds = array<i64: 1>, scalar_prefetch = 0 : i64, scratch_operands = 0 : i64, tpu.core_type = #tpu.core_type<tc>, window_params = [{transform_indices = @transform_0, window_bounds = array<i64: 16, 128>}, {pipeline_mode = #tpu.pipeline_mode<synchronous>, transform_indices = @transform_1, window_bounds = array<i64: 128, 128>}, {pipeline_mode = #tpu.pipeline_mode<synchronous>, transform_indices = @transform_2, window_bounds = array<i64: 1, 128>}, {pipeline_mode = #tpu.pipeline_mode<synchronous>, transform_indices = @transform_3, window_bounds = array<i64: 2, 128, 128>}, {pipeline_mode = #tpu.pipeline_mode<synchronous>, transform_indices = @transform_4, window_bounds = array<i64: 2, 1, 128>}, {transform_indices = @transform_5, window_bounds = array<i64: 16, 128>}]} {
    %c0 = arith.constant 0 : index
    %c0_0 = arith.constant 0 : index
    %0 = vector.load %arg1[%c0, %c0_0] : memref<16x128xf32, #tpu.memory_space<vmem>>, vector<16x128xf32>
    %c0_1 = arith.constant 0 : index
    %c0_2 = arith.constant 0 : index
    %1 = vector.load %arg2[%c0_1, %c0_2] : memref<128x128xf32, #tpu.memory_space<vmem>>, vector<128x128xf32>
    %cst = arith.constant dense<0.000000e+00> : vector<16x128xf32>
    %2 = tpu.matmul %0, %1, %cst {dimension_numbers = #tpu.dot_dimension_numbers<[1], [0], [0], [1], [0, 0, 1, 1], [], []>} : vector<16x128xf32>, vector<128x128xf32>, vector<16x128xf32> -> vector<16x128xf32>
    %c0_3 = arith.constant 0 : index
    %c0_4 = arith.constant 0 : index
    %3 = vector.load %arg3[%c0_3, %c0_4] : memref<1x128xf32, #tpu.memory_space<vmem>>, vector<1x128xf32>
    %4 = vector.broadcast %3 : vector<1x128xf32> to vector<16x128xf32>
    %5 = arith.addf %2, %4 : vector<16x128xf32>
    %cst_5 = arith.constant 0.000000e+00 : f32
    %6 = vector.broadcast %cst_5 : f32 to vector<16x128xf32>
    %7 = arith.maximumf %5, %6 : vector<16x128xf32>
    %c0_6 = arith.constant 0 : index
    %c0_7 = arith.constant 0 : index
    %c0_8 = arith.constant 0 : index
    %8 = vector.load %arg4[%c0_6, %c0_7, %c0_8] : memref<2x128x128xf32, #tpu.memory_space<vmem>>, vector<1x128x128xf32>
    %9 = vector.shape_cast %8 : vector<1x128x128xf32> to vector<128x128xf32>
    %cst_9 = arith.constant dense<0.000000e+00> : vector<16x128xf32>
    %10 = tpu.matmul %7, %9, %cst_9 {dimension_numbers = #tpu.dot_dimension_numbers<[1], [0], [0], [1], [0, 0, 1, 1], [], []>} : vector<16x128xf32>, vector<128x128xf32>, vector<16x128xf32> -> vector<16x128xf32>
    %c0_10 = arith.constant 0 : index
    %c0_11 = arith.constant 0 : index
    %c0_12 = arith.constant 0 : index
    %11 = vector.load %arg5[%c0_10, %c0_11, %c0_12] : memref<2x1x128xf32, #tpu.memory_space<vmem>>, vector<1x1x128xf32>
    %12 = vector.shape_cast %11 : vector<1x1x128xf32> to vector<1x128xf32>
    %13 = vector.broadcast %12 : vector<1x128xf32> to vector<16x128xf32>
    %14 = arith.addf %10, %13 : vector<16x128xf32>
    %cst_13 = arith.constant 0.000000e+00 : f32
    %15 = vector.broadcast %cst_13 : f32 to vector<16x128xf32>
    %16 = arith.maximumf %14, %15 : vector<16x128xf32>
    %c1 = arith.constant 1 : index
    %c0_14 = arith.constant 0 : index
    %c0_15 = arith.constant 0 : index
    %17 = vector.load %arg4[%c1, %c0_14, %c0_15] : memref<2x128x128xf32, #tpu.memory_space<vmem>>, vector<1x128x128xf32>
    %18 = vector.shape_cast %17 : vector<1x128x128xf32> to vector<128x128xf32>
    %cst_16 = arith.constant dense<0.000000e+00> : vector<16x128xf32>
    %19 = tpu.matmul %16, %18, %cst_16 {dimension_numbers = #tpu.dot_dimension_numbers<[1], [0], [0], [1], [0, 0, 1, 1], [], []>} : vector<16x128xf32>, vector<128x128xf32>, vector<16x128xf32> -> vector<16x128xf32>
    %c1_17 = arith.constant 1 : index
    %c0_18 = arith.constant 0 : index
    %c0_19 = arith.constant 0 : index
    %20 = vector.load %arg5[%c1_17, %c0_18, %c0_19] : memref<2x1x128xf32, #tpu.memory_space<vmem>>, vector<1x1x128xf32>
    %21 = vector.shape_cast %20 : vector<1x1x128xf32> to vector<1x128xf32>
    %22 = vector.broadcast %21 : vector<1x128xf32> to vector<16x128xf32>
    %23 = arith.addf %19, %22 : vector<16x128xf32>
    %cst_20 = arith.constant 0.000000e+00 : f32
    %24 = vector.broadcast %cst_20 : f32 to vector<16x128xf32>
    %25 = arith.maximumf %23, %24 : vector<16x128xf32>
    %c0_21 = arith.constant 0 : index
    %c0_22 = arith.constant 0 : index
    %26 = vector.load %arg6[%c0_21, %c0_22] : memref<16x128xf32, #tpu.memory_space<vmem>>, vector<16x128xf32>
    tpu.vector_store %arg6[%c0_21, %c0_22], %25 {strides = array<i32>} : memref<16x128xf32, #tpu.memory_space<vmem>>, vector<16x128xf32>,
    return
  }
  func.func @transform_0(%arg0: i32) -> (i32, i32) {
    %c0_i32 = arith.constant 0 : i32
    %c0_i32_0 = arith.constant 0 : i32
    return %arg0, %c0_i32 : i32, i32
  }
  func.func @transform_1(%arg0: i32) -> (i32, i32) {
    %c0_i32 = arith.constant 0 : i32
    %c0_i32_0 = arith.constant 0 : i32
    %c0_i32_1 = arith.constant 0 : i32
    return %c0_i32, %c0_i32_0 : i32, i32
  }
  func.func @transform_2(%arg0: i32) -> (i32, i32) {
    %c0_i32 = arith.constant 0 : i32
    %c0_i32_0 = arith.constant 0 : i32
    %c0_i32_1 = arith.constant 0 : i32
    return %c0_i32, %c0_i32_0 : i32, i32
  }
  func.func @transform_3(%arg0: i32) -> (i32, i32, i32) {
    %c0_i32 = arith.constant 0 : i32
    %c0_i32_0 = arith.constant 0 : i32
    %c0_i32_1 = arith.constant 0 : i32
    %c0_i32_2 = arith.constant 0 : i32
    return %c0_i32, %c0_i32_0, %c0_i32_1 : i32, i32, i32
  }
  func.func @transform_4(%arg0: i32) -> (i32, i32, i32) {
    %c0_i32 = arith.constant 0 : i32
    %c0_i32_0 = arith.constant 0 : i32
    %c0_i32_1 = arith.constant 0 : i32
    %c0_i32_2 = arith.constant 0 : i32
    return %c0_i32, %c0_i32_0, %c0_i32_1 : i32, i32, i32
  }
  func.func @transform_5(%arg0: i32) -> (i32, i32) {
    %c0_i32 = arith.constant 0 : i32
    %c0_i32_0 = arith.constant 0 : i32
    return %arg0, %c0_i32 : i32, i32
  }
}

</mosaic_0001>

<bundles_post_ra>
// kernel: mlp_forward.1
= control target key start
LH: loop header
LB: loop body
LE: loop exit
PB: predicated region body
PF: predicated region fallthrough
CT: control target
= control target key end

     0   :  { %s800_s1 = inlined_call_operand.vmem [shape: f32[128,128], index: 1, kind: input, shape index: {}]   ;;  %s801_s0 = inlined_call_operand.vmem [shape: f32[16,128], index: 0, kind: input, shape index: {}]   ;;  %s802_s3 = inlined_call_operand.vmem [shape: f32[2,128,128], index: 3, kind: input, shape index: {}]   ;;  %s803_s2 = inlined_call_operand.vmem [shape: f32[1,128], index: 2, kind: input, shape index: {}]   ;;  %s804_s4 = inlined_call_operand.vmem [shape: f32[2,1,128], index: 4, kind: input, shape index: {}]   ;;  %s805_s5 = inlined_call_operand.vmem [shape: f32[16,128], index: 5, kind: output, shape index: {}]  }
   0x1   :  { %v22_v0 = vld [vmem:[%s800_s1] sm:$0xff]  ;;  %v23_v1 = vld [vmem:[%s800_s1 + $0x8] sm:$0xff]  ;;  %v24_v2 = vld [vmem:[%s800_s1 + $0x10] sm:$0xff] }
   0x2   :  { %v509_v3 = vpack.c.bf16 %v23_v1, %v22_v0  ;;  %v25_v4 = vld [vmem:[%s800_s1 + $0x18] sm:$0xff]  ;;  %v26_v6 = vld [vmem:[%s800_s1 + $0x20] sm:$0xff]  ;;  %v27_v7 = vld [vmem:[%s800_s1 + $0x28] sm:$0xff] }
   0x3   :  { %v513_v5 = vpack.c.bf16 %v25_v4, %v24_v2  ;;  %v517_v8 = vpack.c.bf16 %v27_v7, %v26_v6  ;;  %v28_v9 = vld [vmem:[%s800_s1 + $0x30] sm:$0xff]  ;;  %v29_v10 = vld [vmem:[%s800_s1 + $0x38] sm:$0xff]  ;;  %v20_v11 = vld [vmem:[%s801_s0] sm:$0xff] }
   0x4   :  { %510 = vmatprep.subr.bf16.mxu0 %v509_v3  ;;  %436 = vmatprep.mubr.f32.mxu0 %v20_v11  ;;  %v122_v12 = vld [vmem:[%s802_s3] sm:$0xff]  ;;  %v123_v13 = vld [vmem:[%s802_s3 + $0x8] sm:$0xff]  ;;  %v124_v14 = vld [vmem:[%s802_s3 + $0x10] sm:$0xff]  ;;  %v521_v20 = vpack.c.bf16 %v29_v10, %v28_v9 }
   0x5   :  { %512 = vmatpush3.bf16.msra.mxu0 %v509_v3  ;;  %v541_v15 = vpack.c.bf16 %v123_v13, %v122_v12  ;;  %v125_v16 = vld [vmem:[%s802_s3 + $0x18] sm:$0xff]  ;;  %v126_v18 = vld [vmem:[%s802_s3 + $0x20] sm:$0xff]  ;;  %v127_v19 = vld [vmem:[%s802_s3 + $0x28] sm:$0xff] }
   0x6   :  { %514 = vmatprep.subr.bf16.mxu0 %v513_v5  ;;  %v545_v17 = vpack.c.bf16 %v125_v16, %v124_v14  ;;  %v30_v21 = vld [vmem:[%s800_s1 + $0x40] sm:$0xff]  ;;  %v31_v22 = vld [vmem:[%s800_s1 + $0x48] sm:$0xff]  ;;  %v549_v23 = vpack.c.bf16 %v127_v19, %v126_v18  ;;  %v128_v24 = vld [vmem:[%s802_s3 + $0x30] sm:$0xff] }
   0x7   :  { %542 = vmatprep.subr.bf16.mxu1 %v541_v15  ;;  %v129_v25 = vld [vmem:[%s802_s3 + $0x38] sm:$0xff]  ;;  %v525_v26 = vpack.c.bf16 %v31_v22, %v30_v21  ;;  %v32_v27 = vld [vmem:[%s800_s1 + $0x50] sm:$0xff]  ;;  %v130_v30 = vld [vmem:[%s802_s3 + $0x40] sm:$0xff] }
   0x8   :  { %544 = vmatpush3.bf16.msra.mxu1 %v541_v15  ;;  %v33_v28 = vld [vmem:[%s800_s1 + $0x58] sm:$0xff]  ;;  %v553_v29 = vpack.c.bf16 %v129_v25, %v128_v24  ;;  %v131_v31 = vld [vmem:[%s802_s3 + $0x48] sm:$0xff]  ;;  %v34_v33 = vld [vmem:[%s800_s1 + $0x60] sm:$0xff] }
   0x9   :  { %516 = vmatpush3.bf16.msra.mxu0 %v513_v5  ;;  %546 = vmatprep.subr.bf16.mxu1 %v545_v17  ;;  %v529_v32 = vpack.c.bf16 %v33_v28, %v32_v27  ;;  %v35_v34 = vld [vmem:[%s800_s1 + $0x68] sm:$0xff]  ;;  %v557_v35 = vpack.c.bf16 %v131_v31, %v130_v30  ;;  %v132_v36 = vld [vmem:[%s802_s3 + $0x50] sm:$0xff]  ;;  %v133_v37 = vld [vmem:[%s802_s3 + $0x58] sm:$0xff] }
   0xa   :  { %518 = vmatprep.subr.bf16.mxu0 %v517_v8  ;;  %v533_v38 = vpack.c.bf16 %v35_v34, %v34_v33  ;;  %v36_v39 = vld [vmem:[%s800_s1 + $0x70] sm:$0xff]  ;;  %v37_v40 = vld [vmem:[%s800_s1 + $0x78] sm:$0xff]  ;;  %v561_v41 = vpack.c.bf16 %v133_v37, %v132_v36  ;;  %v134_v42 = vld [vmem:[%s802_s3 + $0x60] sm:$0xff] }
   0xb   :  { %v135_v43 = vld [vmem:[%s802_s3 + $0x68] sm:$0xff]  ;;  %v537_v44 = vpack.c.bf16 %v37_v40, %v36_v39  ;;  %v136_v47 = vld [vmem:[%s802_s3 + $0x70] sm:$0xff]  ;;  %v137_v48 = vld [vmem:[%s802_s3 + $0x78] sm:$0xff] }
   0xc   :  { %548 = vmatpush3.bf16.msra.mxu1 %v545_v17  ;;  %v565_v45 = vpack.c.bf16 %v135_v43, %v134_v42  ;;  %v21_v46 = vld [vmem:[%s801_s0 + $0x8] sm:$0xff]  ;;  %v569_v49 = vpack.c.bf16 %v137_v48, %v136_v47  ;;  %v332_v50 = vld [vmem:[%s802_s3 + $0x80] sm:$0xff]  ;;  %v334_v52 = vld [vmem:[%s802_s3 + $0x90] sm:$0xff] }
   0xd   :  { %520 = vmatpush3.bf16.msra.mxu0 %v517_v8  ;;  %550 = vmatprep.subr.bf16.mxu1 %v549_v23  ;;  %v333_v51 = vld [vmem:[%s802_s3 + $0x88] sm:$0xff]  ;;  %v335_v54 = vld [vmem:[%s802_s3 + $0x98] sm:$0xff]  ;;  %v336_v56 = vld [vmem:[%s802_s3 + $0xa0] sm:$0xff] }
   0xe   :  { %522 = vmatprep.subr.bf16.mxu0 %v521_v20  ;;  %v573_v53 = vpack.c.bf16 %v333_v51, %v332_v50  ;;  %v577_v55 = vpack.c.bf16 %v335_v54, %v334_v52  ;;  %v337_v57 = vld [vmem:[%s802_s3 + $0xa8] sm:$0xff]  ;;  %v338_v59 = vld [vmem:[%s802_s3 + $0xb0] sm:$0xff]  ;;  %v339_v60 = vld [vmem:[%s802_s3 + $0xb8] sm:$0xff] }
   0xf   :  { %v581_v58 = vpack.c.bf16 %v337_v57, %v336_v56  ;;  %v585_v61 = vpack.c.bf16 %v339_v60, %v338_v59  ;;  %v340_v62 = vld [vmem:[%s802_s3 + $0xc0] sm:$0xff]  ;;  %v341_v63 = vld [vmem:[%s802_s3 + $0xc8] sm:$0xff]  ;;  %v342_v1 = vld [vmem:[%s802_s3 + $0xd0] sm:$0xff] }
  0x10   :  { %552 = vmatpush3.bf16.msra.mxu1 %v549_v23  ;;  %v589_v0 = vpack.c.bf16 %v341_v63, %v340_v62  ;;  %v343_v2 = vld [vmem:[%s802_s3 + $0xd8] sm:$0xff]  ;;  %v344_v4 = vld [vmem:[%s802_s3 + $0xe0] sm:$0xff]  ;;  %v345_v5 = vld [vmem:[%s802_s3 + $0xe8] sm:$0xff] }
  0x11   :  { %524 = vmatpush3.bf16.msra.mxu0 %v521_v20  ;;  %554 = vmatprep.subr.bf16.mxu1 %v553_v29  ;;  %v593_v3 = vpack.c.bf16 %v343_v2, %v342_v1  ;;  %v597_v6 = vpack.c.bf16 %v345_v5, %v344_v4  ;;  %v330_v7 = vld [vmem:[%s803_s2] ss:$0 sm:$0xff]  ;;  %v346_v14 = vld [vmem:[%s802_s3 + $0xf0] sm:$0xff]  ;;  %v347_v15 = vld [vmem:[%s802_s3 + $0xf8] sm:$0xff] }
  0x12   :  { %526 = vmatprep.subr.bf16.mxu0 %v525_v26  ;;  %v601_v16 = vpack.c.bf16 %v347_v15, %v346_v14  ;;  %v331_v17 = vld [vmem:[%s804_s4] ss:$0 sm:$0xff]  ;;  %v349_v24 = vld [vmem:[%s804_s4 + $0x1] ss:$0 sm:$0xff] }
  0x14   :  { %556 = vmatpush3.bf16.msra.mxu1 %v553_v29 }
  0x15   :  { %528 = vmatpush3.bf16.msra.mxu0 %v525_v26  ;;  %558 = vmatprep.subr.bf16.mxu1 %v557_v35 }
  0x16   :  { %530 = vmatprep.subr.bf16.mxu0 %v529_v32 }
  0x18   :  { %560 = vmatpush3.bf16.msra.mxu1 %v557_v35 }
  0x19   :  { %532 = vmatpush3.bf16.msra.mxu0 %v529_v32  ;;  %562 = vmatprep.subr.bf16.mxu1 %v561_v41 }
  0x1a   :  { %534 = vmatprep.subr.bf16.mxu0 %v533_v38 }
  0x1c   :  { %564 = vmatpush3.bf16.msra.mxu1 %v561_v41 }
  0x1d   :  { %536 = vmatpush3.bf16.msra.mxu0 %v533_v38  ;;  %566 = vmatprep.subr.bf16.mxu1 %v565_v45 }
  0x1e   :  { %538 = vmatprep.subr.bf16.mxu0 %v537_v44 }
  0x20   :  { %568 = vmatpush3.bf16.msra.mxu1 %v565_v45 }
  0x21   :  { %540 = vmatpush3.bf16.msra.mxu0 %v537_v44  ;;  %570 = vmatprep.subr.bf16.mxu1 %v569_v49 }
  0x22   :  { %574 = vmatprep.subr.bf16.mxu0 %v573_v53 }
  0x24   :  { %437 = vmatmul.mubr.f32.vlgmr.msra.gmra.mrb[0].mxu0 %v21_v46  ;;  %572 = vmatpush3.bf16.msra.mxu1 %v569_v49 }
  0x25   :  { %576 = vmatpush3.bf16.msra.mxu0 %v573_v53 }
  0x26   :  { %578 = vmatprep.subr.bf16.mxu0 %v577_v55 }
  0x29   :  { %580 = vmatpush3.bf16.msra.mxu0 %v577_v55 }
  0x2a   :  { %582 = vmatprep.subr.bf16.mxu0 %v581_v58 }
  0x2d   :  { %584 = vmatpush3.bf16.msra.mxu0 %v581_v58 }
  0x2e   :  { %586 = vmatprep.subr.bf16.mxu0 %v585_v61 }
  0x31   :  { %588 = vmatpush3.bf16.msra.mxu0 %v585_v61 }
  0x32   :  { %590 = vmatprep.subr.bf16.mxu0 %v589_v0 }
  0x35   :  { %592 = vmatpush3.bf16.msra.mxu0 %v589_v0 }
  0x36   :  { %594 = vmatprep.subr.bf16.mxu0 %v593_v3 }
  0x39   :  { %596 = vmatpush3.bf16.msra.mxu0 %v593_v3 }
  0x3a   :  { %598 = vmatprep.subr.bf16.mxu0 %v597_v6 }
  0x3d   :  { %600 = vmatpush3.bf16.msra.mxu0 %v597_v6 }
  0x3e   :  { %602 = vmatprep.subr.bf16.mxu0 %v601_v16 }
  0x41   :  { %604 = vmatpush3.bf16.msra.mxu0 %v601_v16 }
  0xf7   :  { %v438_v8 = vpop.f32.mrb[0].mxu0 }
  0xf8   :  { %v117_v9 = vadd.f32 %v438_v8, %v330_v7  ;;  %v111_v10 = vpop.f32.mrb[1].mxu0 }
  0xf9   :  { %v112_v11 = vadd.f32 %v330_v7, %v111_v10 }
  0xfa   :  { %v121_v13 = vmax.f32 %v117_v9, 0.0 }
  0xfb   :  { %v120_v12 = vmax.f32 %v112_v11, 0.0 }
  0xfd   :  { %471 = vmatprep.mubr.f32.mxu1 %v120_v12 }
  0xfe   :  { %472 = vmatmul.mubr.f32.vlgmr.msra.gmra.mrb[0].mxu1 %v121_v13 }
 0x1d1   :  { %v473_v18 = vpop.f32.mrb[0].mxu1 }
 0x1d2   :  { %v217_v19 = vadd.f32 %v473_v18, %v331_v17  ;;  %v211_v20 = vpop.f32.mrb[1].mxu1 }
 0x1d3   :  { %v212_v21 = vadd.f32 %v331_v17, %v211_v20 }
 0x1d4   :  { %v221_v23 = vmax.f32 %v217_v19, 0.0 }
 0x1d5   :  { %v220_v22 = vmax.f32 %v212_v21, 0.0 }
 0x1d7   :  { %506 = vmatprep.mubr.f32.mxu0 %v220_v22 }
 0x1d8   :  { %507 = vmatmul.mubr.f32.vlgmr.msra.gmra.mrb[2].mxu0 %v221_v23 }
 0x2ab   :  { %v508_v25 = vpop.f32.mrb[2].mxu0 }
 0x2ac   :  { %v319_v26 = vadd.f32 %v508_v25, %v349_v24  ;;  %v313_v27 = vpop.f32.mrb[3].mxu0 }
 0x2ad   :  { %v314_v28 = vadd.f32 %v349_v24, %v313_v27 }
 0x2ae   :  { %v323_v29 = vmax.f32 %v319_v26, 0.0 }
 0x2af   :  { %v322_v30 = vmax.f32 %v314_v28, 0.0 }
 0x2b0   :  { %325 = vst [vmem:[%s805_s5 + $0x8] sm:$0xff] %v323_v29 }
 0x2b1   :  { %324 = vst [vmem:[%s805_s5] sm:$0xff] %v322_v30 }

</bundles_post_ra>
